<compile_context>
chip_gen: v6e
topology: v6e:2x2x1
jax: 0.10.0
libtpu: 0.0.40
codegen_flags: <defaults>
</compile_context>

<pallas_src>
import numpy as np
import jax
import jax.numpy as jnp
from jax.experimental import pallas as pl
from jax.experimental.pallas import tpu as pltpu

EPS = 1e-5


def _interp_matrix(n_in: int, n_out: int) -> np.ndarray:
    """(n_out, n_in) bilinear interpolation matrix, align_corners=True. Rows sum to 1."""
    A = np.zeros((n_out, n_in), dtype=np.float32)
    if n_in == 1 or n_out == 1:          # degenerate sizes: nearest / copy
        A[:, 0] = 1.0
        return A
    src = np.arange(n_out, dtype=np.float64) * (n_in - 1) / (n_out - 1)
    i0 = np.clip(np.floor(src).astype(np.int64), 0, n_in - 2)
    i1 = i0 + 1
    w = (src - i0).astype(np.float32)
    A[np.arange(n_out), i0] += 1.0 - w
    A[np.arange(n_out), i1] += w
    return A


def _moments_kernel(x_ref, g_ref, s_ref):
    """Per-image input moments for BN stats: Gram matrix X X^T and per-channel sums.

    x_ref block: (1, C_in, H*W) lane-dense.  Outputs go to per-image rows, so the
    grid axis stays 'parallel' (megacore-friendly); the wrapper sums over images.
    """
    X = x_ref[0]                                                  # (C_in, H*W)
    g_ref[0] = jnp.einsum('cs,ds->cd', X, X,
                          preferred_element_type=jnp.float32)     # (C_in, C_in)
    s_ref[0] = jnp.sum(X, axis=1, keepdims=True)                  # (C_in, 1)


def _upsample_mix_kernel(x_ref, awt_ref, ah_ref, w_ref, b_ref, o_ref):
    """Separable bilinear upsample + folded conv1x1/BN affine, lane-dense output.

    x_ref block: (1, C_in*H, W).  Output block: (1, C_out, Ho*Wo).
    """
    Ho, H = ah_ref.shape
    Wo = awt_ref.shape[1]
    C_out, C_in = w_ref.shape

    xr = x_ref[0]                                                 # (C_in*H, W)
    # Width pass: one collapsed matmul  (M = C_in*H, K = W, N = Wo).
    t = jnp.dot(xr, awt_ref[...], preferred_element_type=jnp.float32)   # (C_in*H, Wo)
    t3 = t.reshape(C_in, H, Wo)                                   # cheap shape cast
    # Height pass: batched over channels; A_h broadcast in VMEM only (no HBM copies).
    ah_b = jnp.broadcast_to(ah_ref[...][None, :, :], (C_in, Ho, H))
    u = jnp.einsum('cyh,chv->cyv', ah_b, t3,
                   preferred_element_type=jnp.float32)            # (C_in, Ho, Wo)
    # Flatten spatial into the lane axis on the *smaller* C_in-channel tensor
    # (single in-VMEM relayout), then one lane-dense channel-mix matmul + bias.
    u2 = u.reshape(C_in, Ho * Wo)                                 # (C_in, Ho*Wo)
    y = jnp.dot(w_ref[...], u2, preferred_element_type=jnp.float32) + b_ref[...]
    o_ref[0] = y.astype(o_ref.dtype)                              # unmasked lane-dense store


def upsample_connection(x_nchw, conv_w, conv_b, bn_gamma, bn_beta, factor=2):
    """x_nchw: (N, C_in, H, W) float32.  Returns (N, C_out, H*factor, W*factor)."""
    N, C_in, H, W = x_nchw.shape
    C_out = conv_w.shape[0]
    assert C_out % 2 == 0   # mirrors the nn.Module's own assert
    Ho, Wo = H * factor, W * factor
    cnt = N * H * W
    x = x_nchw.astype(jnp.float32)

    # ---------------- pass 1: per-image input moments (grid 'parallel') -----------
    x_cm = x.reshape(N, C_in, H * W)          # free contiguous view, lane-dense
    gram, sums = pl.pallas_call(
        _moments_kernel,
        out_shape=(jax.ShapeDtypeStruct((N, C_in, C_in), jnp.float32),
                   jax.ShapeDtypeStruct((N, C_in, 1), jnp.float32)),
        grid=(N,),
        in_specs=[pl.BlockSpec((1, C_in, H * W), lambda n: (n, 0, 0))],
        out_specs=(pl.BlockSpec((1, C_in, C_in), lambda n: (n, 0, 0)),
                   pl.BlockSpec((1, C_in, 1), lambda n: (n, 0, 0))),
        compiler_params=pltpu.CompilerParams(dimension_semantics=("parallel",)),
    )(x_cm)

    # tiny reductions + conv/BN fold in the wrapper (negligible work for XLA)
    G = jnp.sum(gram, axis=0)                                     # (C_in, C_in)
    S = jnp.sum(sums, axis=0)[:, 0]                               # (C_in,)
    mean_x = S / cnt
    # NOTE: E[x x^T] - mean mean^T is cancellation-prone when |mean| >> std; fine
    # at these magnitudes / 1e-4 tolerance.
    cov_x = G / cnt - jnp.outer(mean_x, mean_x)

    W2 = conv_w.reshape(C_out, C_in).astype(jnp.float32)
    b0 = conv_b.astype(jnp.float32)
    mean_y = W2 @ mean_x + b0
    var_y = jnp.maximum(jnp.sum((W2 @ cov_x) * W2, axis=1), 0.0)  # biased batch var of y
    scale = bn_gamma.astype(jnp.float32) * jax.lax.rsqrt(var_y + EPS)
    # fold conv + BN:  y' = (scale*W) x + (scale*(b - mean_y) + beta)
    w_aff = W2 * scale[:, None]                                   # (C_out, C_in)
    b_aff = (scale * (b0 - mean_y) + bn_beta.astype(jnp.float32)).reshape(C_out, 1)

    # separable align_corners=True interpolation matrices (a few KiB, 2-D, unreplicated)
    A_h = jnp.asarray(_interp_matrix(H, Ho))                      # (Ho, H)
    A_wT = jnp.asarray(_interp_matrix(W, Wo).T)                   # (W, Wo)

    # ---------------- pass 2: upsample + folded affine, lane-dense output ---------
    x_rw = x.reshape(N, C_in * H, W)          # free contiguous view for the width matmul
    flops = 2 * N * (C_in * H * W * Wo + C_in * Ho * H * Wo + C_out * C_in * Ho * Wo)
    bytes_accessed = 4 * (x.size + N * C_out * Ho * Wo)

    out_flat = pl.pallas_call(
        _upsample_mix_kernel,
        out_shape=jax.ShapeDtypeStruct((N, C_out, Ho * Wo), jnp.float32),
        grid=(N,),
        in_specs=[
            pl.BlockSpec((1, C_in * H, W), lambda n: (n, 0, 0)),
            pl.BlockSpec((W, Wo), lambda n: (0, 0)),
            pl.BlockSpec((Ho, H), lambda n: (0, 0)),
            pl.BlockSpec((C_out, C_in), lambda n: (0, 0)),
            pl.BlockSpec((C_out, 1), lambda n: (0, 0)),
        ],
        out_specs=pl.BlockSpec((1, C_out, Ho * Wo), lambda n: (n, 0, 0)),
        compiler_params=pltpu.CompilerParams(
            dimension_semantics=("parallel",),
            vmem_limit_bytes=32 * 1024 * 1024),
        cost_estimate=pl.CostEstimate(flops=flops, transcendentals=0,
                                      bytes_accessed=bytes_accessed),
    )(x_rw, A_wT, A_h, w_aff, b_aff)

    return out_flat.reshape(N, C_out, Ho, Wo)   # free reshape of contiguous HBM


def _reference(x, conv_w, conv_b, gamma, beta, factor=2):
    """Plain-JAX reference mirroring PyTorch semantics (NCHW, training-mode BN)."""
    w2d = conv_w.reshape(conv_w.shape[0], conv_w.shape[1])
    y = jnp.einsum('oc,nchw->nohw', w2d, x) + conv_b[None, :, None, None]
    mean = y.mean(axis=(0, 2, 3), keepdims=True)
    var = jnp.square(y - mean).mean(axis=(0, 2, 3), keepdims=True)
    ybn = (y - mean) / jnp.sqrt(var + EPS) * gamma[None, :, None, None] \
        + beta[None, :, None, None]
    N, C, H, W = ybn.shape
    Ho, Wo = H * factor, W * factor
    src_h = jnp.arange(Ho) * (H - 1) / (Ho - 1)
    h0 = jnp.clip(jnp.floor(src_h).astype(jnp.int32), 0, H - 2)
    h1 = h0 + 1
    wh = (src_h - h0).astype(jnp.float32)
    src_w = jnp.arange(Wo) * (W - 1) / (Wo - 1)
    w0 = jnp.clip(jnp.floor(src_w).astype(jnp.int32), 0, W - 2)
    w1 = w0 + 1
    ww = (src_w - w0).astype(jnp.float32)
    top = ybn[:, :, h0, :] * (1 - wh)[None, None, :, None] \
        + ybn[:, :, h1, :] * wh[None, None, :, None]
    out = top[:, :, :, w0] * (1 - ww)[None, None, None, :] \
        + top[:, :, :, w1] * ww[None, None, None, :]
    return out


if __name__ == "__main__":
    N, C_in, C_out, H, W, factor = 2, 4, 8, 16, 16, 2

    key = jax.random.PRNGKey(0)
    kx, kw, kb, kg, kbeta = jax.random.split(key, 5)
    x = jax.random.normal(kx, (N, C_in, H, W), dtype=jnp.float32)
    conv_w = jax.random.normal(kw, (C_out, C_in, 1, 1), dtype=jnp.float32) * 0.5
    conv_b = jax.random.normal(kb, (C_out,), dtype=jnp.float32) * 0.1
    bn_gamma = 1.0 + 0.1 * jax.random.normal(kg, (C_out,), dtype=jnp.float32)
    bn_beta = 0.1 * jax.random.normal(kbeta, (C_out,), dtype=jnp.float32)

    out = upsample_connection(x, conv_w, conv_b, bn_gamma, bn_beta, factor=factor)
    out = jax.block_until_ready(out)

    ref = _reference(x, conv_w, conv_b, bn_gamma, bn_beta, factor=factor)
    assert out.shape == (N, C_out, H * factor, W * factor), out.shape
    np.testing.assert_allclose(np.asarray(out), np.asarray(ref), rtol=1e-4, atol=1e-4)

    print("KERNEL_OK")
</pallas_src>

<mosaic_0001>
module attributes {stable_mosaic.version = 11 : i64} {
  func.func @_moments_kernel(%arg0: i32, %arg1: memref<1x4x256xf32, #tpu.memory_space<vmem>>, %arg2: memref<1x4x4xf32, #tpu.memory_space<vmem>>, %arg3: memref<1x4x1xf32, #tpu.memory_space<vmem>>) attributes {dimension_semantics = [#tpu.dimension_semantics<parallel>], iteration_bounds = array<i64: 2>, scalar_prefetch = 0 : i64, scratch_operands = 0 : i64, tpu.core_type = #tpu.core_type<tc>, window_params = [{transform_indices = @transform_0, window_bounds = array<i64: 1, 4, 256>}, {transform_indices = @transform_1, window_bounds = array<i64: 1, 4, 4>}, {transform_indices = @transform_2, window_bounds = array<i64: 1, 4, 1>}]} {
    %c0 = arith.constant 0 : index
    %c0_0 = arith.constant 0 : index
    %c0_1 = arith.constant 0 : index
    %0 = vector.load %arg1[%c0, %c0_0, %c0_1] : memref<1x4x256xf32, #tpu.memory_space<vmem>>, vector<1x4x256xf32>
    %1 = vector.shape_cast %0 : vector<1x4x256xf32> to vector<4x256xf32>
    "tpu.trace_start"() <{level = 10 : i32, message = "cs,ds->cd"}> : () -> ()
    %cst = arith.constant dense<0.000000e+00> : vector<4x4xf32>
    %2 = tpu.matmul %1, %1, %cst {dimension_numbers = #tpu.dot_dimension_numbers<[1], [1], [0], [0], [0, 0, 1, 0], [], []>} : vector<4x256xf32>, vector<4x256xf32>, vector<4x4xf32> -> vector<4x4xf32>
    "tpu.trace_stop"() : () -> ()
    %c0_2 = arith.constant 0 : index
    %c0_3 = arith.constant 0 : index
    %c0_4 = arith.constant 0 : index
    %3 = vector.load %arg2[%c0_2, %c0_3, %c0_4] : memref<1x4x4xf32, #tpu.memory_space<vmem>>, vector<1x4x4xf32>
    %4 = vector.shape_cast %3 : vector<1x4x4xf32> to vector<4x4xf32>
    %5 = vector.shape_cast %2 : vector<4x4xf32> to vector<1x4x4xf32>
    tpu.vector_store %arg2[%c0_2, %c0_3, %c0_4], %5 {strides = array<i32>} : memref<1x4x4xf32, #tpu.memory_space<vmem>>, vector<1x4x4xf32>,
    %cst_5 = arith.constant dense<0.000000e+00> : vector<4xf32>
    %6 = vector.multi_reduction <add>, %1, %cst_5 [1] : vector<4x256xf32> to vector<4xf32>
    %7 = vector.shape_cast %6 : vector<4xf32> to vector<4x1xf32>
    %c0_6 = arith.constant 0 : index
    %c0_7 = arith.constant 0 : index
    %c0_8 = arith.constant 0 : index
    %8 = vector.load %arg3[%c0_6, %c0_7, %c0_8] : memref<1x4x1xf32, #tpu.memory_space<vmem>>, vector<1x4x1xf32>
    %9 = vector.shape_cast %8 : vector<1x4x1xf32> to vector<4x1xf32>
    %10 = vector.shape_cast %7 : vector<4x1xf32> to vector<1x4x1xf32>
    tpu.vector_store %arg3[%c0_6, %c0_7, %c0_8], %10 {strides = array<i32>} : memref<1x4x1xf32, #tpu.memory_space<vmem>>, vector<1x4x1xf32>,
    return
  }
  func.func @transform_0(%arg0: i32) -> (i32, i32, i32) {
    %c0_i32 = arith.constant 0 : i32
    %c0_i32_0 = arith.constant 0 : i32
    %c0_i32_1 = arith.constant 0 : i32
    return %arg0, %c0_i32, %c0_i32_0 : i32, i32, i32
  }
  func.func @transform_1(%arg0: i32) -> (i32, i32, i32) {
    %c0_i32 = arith.constant 0 : i32
    %c0_i32_0 = arith.constant 0 : i32
    %c0_i32_1 = arith.constant 0 : i32
    return %arg0, %c0_i32, %c0_i32_0 : i32, i32, i32
  }
  func.func @transform_2(%arg0: i32) -> (i32, i32, i32) {
    %c0_i32 = arith.constant 0 : i32
    %c0_i32_0 = arith.constant 0 : i32
    %c0_i32_1 = arith.constant 0 : i32
    return %arg0, %c0_i32, %c0_i32_0 : i32, i32, i32
  }
}

</mosaic_0001>

<bundles_post_ra>
// kernel: tpu_custom_call.1
= control target key start
LH: loop header
LB: loop body
LE: loop exit
PB: predicated region body
PF: predicated region fallthrough
CT: control target
= control target key end

     0   :  { %8 = vsyncpa [#allocation3], 0  ;;  %s702_s0 = inlined_call_operand.hbm [shape: f32[2,4,256], index: 0, kind: input, shape index: {}]   ;;  %s703_s1 = inlined_call_operand.hbm [shape: f32[2,4,4], index: 1, kind: output, shape index: {0}]   ;;  %s704_s2 = inlined_call_operand.vmem [shape: f32[2,4,1], index: 2, kind: output, shape index: {1}]  }
   0x1   :  { %10 = vsyncpa [#allocation3 + $0x1], 0 }
   0x2   :  { %11 = vsyncpa [#allocation4], 0 }
   0x3   :  { %13 = vsyncpa [#allocation4 + $0x1], 0  ;;  %s543_s9 = smov 0   ;;  %s545_s10 = smov 0  }
   0x4   :  { %s547_s11 = smov 0   ;;  %s549_s12 = smov 0  }
   0x5 LB: > { %s564_s13 = sadd.s32 4294967295, %s524_s12   ;;  %s370_s14 = sadd.s32 4294967294, %s524_s12   ;;  %s524_s12 = sphi %s549_s12, %s721_s12   ;;  %s520_s11 = sphi %s547_s11, %s720_s11   ;;  %s516_s10 = sphi %s545_s10, %s719_s10   ;;  %s512_s9 = sphi %s543_s9, %s718_s9  }
   0x6   : > { %s568_s15 = sadd.s32 1, %s524_s12   ;;  %s26_s16 = sadd.s32 1, %s520_s11 }
   0x7   : > { %s23_s17 = ssub.s32 %s524_s12, %s568_s15  ;;  %p33_p0 = scmp.ne.s32.totalorder %s520_s11, %s516_s10 }
   0x8   : > { %p24_p1 = scmp.eq.s32.totalorder %s23_s17, 0  ;;  %p34_p2 = scmp.eq.s32.totalorder %s524_s12, 0 }
   0x9   : > { %p39_p3 = scmp.ne.s32.totalorder %s516_s10, %s512_s9  ;;  %p40_p4 = scmp.eq.s32.totalorder %s564_s13, 0 }
   0xa   : > { %s580_s18 = scalar_select %p24_p1, %s520_s11, %s26_s16  }
   0xb   : > { %p582_p5 = por %p34_p2, %p33_p0  ;;  %p586_p6 = por %p40_p4, %p39_p3 }
   0xc   : > { %p63_p7 = scmp.eq.s32.totalorder %s564_s13, 1  ;;  %p69_p8 = scmp.eq.s32.totalorder %s370_s14, 1 }
   0xd   : > { %s708_s20 = scalar_select %p586_p6, 1, 0 }
   0xe   : > { %p397_p10 = scmp.lt.s32.totalorder %s524_s12, 2  ;;  %p593_p11 = por %p63_p7, %p33_p0 }
   0xf   : > { %p597_p12 = por %p69_p8, %p39_p3  ;;  %s115_s23 = sand.u32 1, %s520_s11  }
  0x10   : > { %s709_s21 = scalar_select %p593_p11, 1, 0 }
  0x11   : > { %s710_s22 = scalar_select %p597_p12, 1, 0 }
  0x12   : > { %s384_s24 = sshll.u32 %s524_s12, 7  ;;  %s373_s25 = sshll.u32 %s115_s23, 3 }
  0x13   : > { %s606_s28 = scalar_lea.hbm %s702_s0, %s384_s24  ;;  %s119_s29 = scalar_lea.vmem [#allocation2], %s373_s25 }
  0x14   : > { %s127_s30 = sshll.u32 %s119_s29, 4  ;;  %p610_p13 = pnand %p397_p10, %p582_p5  ;;  %s614_s30 = int_to_ptr.vmem [resolvable:$true] %s127_s30 }
  0x15   : > { %s116_s4 = scalar_lea.sflag [#allocation3], %s115_s23  ;;  %s432_s5 = scalar_lea.hbm %s606_s28, 128 }
  0x16   : > { %p433_p2 = scmp.ne.s32.totalorder %s606_s28, %s432_s5  ;;  %p434_p3 = pneg %p610_p13 }
  0x17   : > { %s437_s8 = scalar_lea.hbm %s702_s0, 256  ;;  %p438_p5 = scmp.lt.s32.totalorder %s606_s28, %s702_s0 }
  0x18   : > { %p435_p4 = pnand %p434_p3, %p433_p2  ;;  %p439_p8 = scmp.lt.s32.totalorder %s437_s8, %s432_s5 }
  0x1a   : > { %p436_p7 = pneg %p435_p4  ;;  %p440_p10 = por %p439_p8, %p438_p5 }
  0x1c   : > { %p441_p9 = pnand %p440_p10, %p436_p7 }
  0x1e   : > { %444 = shalt.err (!%p441_p9)
}
  0x1f   : > { %s445_s17 = scalar_lea.vmem %s614_s30, 128  ;;  %s526_s19 = smov [#allocation2]  }
  0x20   : > { %p446_p0 = scmp.ne.s32.totalorder %s614_s30, %s445_s17  ;;  %s450_s23 = sshll.u32 %s526_s19, 4  ;;  %s451_s23 = int_to_ptr.vmem [resolvable:$false] %s450_s23 }
  0x21   : > { %s452_s24 = scalar_lea.vmem %s451_s23, 256  ;;  %p453_p4 = scmp.lt.s32.totalorder %s614_s30, %s451_s23 }
  0x22   : > { %p448_p1 = pnand %p446_p0, %p434_p3  ;;  %p454_p12 = scmp.lt.s32.totalorder %s452_s24, %s445_s17 }
  0x24   : > { %p449_p2 = pneg %p448_p1  ;;  %p455_p11 = por %p454_p12, %p453_p4 }
  0x26   : > { %p456_p6 = pnand %p455_p11, %p449_p2 }
  0x28   : > { %459 = shalt.err (!%p456_p6)
}
  0x29   : > { %392 = dma.hbm_to_vmem [thread:$0]  (!%p610_p13), %s606_s28, 128, %s614_s30, %s116_s4  }
  0x2a   : > { %p712_p9 = scmp.lt.s32.totalorder %s524_s12, 3  ;;  %p713_p7 = scmp.ge.s32.totalorder %s524_s12, 1 }
  0x2c   : > { %p133_p0 = pnand %p713_p7, %p712_p9 }
  0x2d   : > { %s641_s25 = sand.u32 (!%p133_p0), 1, %s516_s10   ;;  %p714_p6 = scmp.ne.s32.totalorder (!%p133_p0), %s708_s20, 0 }
  0x2e   : > { %136 = sbr.rel (%p133_p0) target bundleno = 266 (0x10a), region = 24  ;;  %s377_s26 = sshll.u32 (!%p133_p0), %s641_s25, 3 }
  0x2f   : > { %s139_s27 = scalar_lea.sflag (!%p133_p0), [#allocation3], %s641_s25  ;;  %s142_s29 = scalar_lea.vmem (!%p133_p0), [#allocation2], %s377_s26 }
  0x33   : > { %503 = dma.done.wait (%p714_p6), %s139_s27, 128  }
  0x34   : > { %505 = vsyncadd (%p714_p6), %s139_s27, 4294967168  ;;  %vm247_vm0 = vcmask 1043456   ;;  %v171_v0 = vld [vmem:[%s142_s29] sm:$0xff]  ;;  %p167_p11 = scmp.lt.s32.totalorder %s564_s13, 1  ;;  %vm253_vm1 = vcmask 3072   ;;  %s378_s5 = sshll.u32 %s641_s25, 2 }
  0x35   : > { %v173_v1 = vcombine.high %v171_v0, %v171_v0  ;;  %v248_v2 = vsel %vm247_vm0, %v171_v0, 0.0  ;;  %s381_s6 = sshll.u32 %s564_s13, 6  ;;  %s160_s7 = scalar_lea.vmem [#allocation5], %s378_s5  ;;  %vm245_vm2 = vcmask 27648  }
  0x36   : > { %s168_s28 = scalar_select %p167_p11, %s564_s13, 1 }
  0x37   : > { %205 = vmatprep.subr.mxu0 %v173_v1  ;;  %239 = vmatprep.mubr.f32.mxu0 %v173_v1  ;;  %v249_v3 = vsel %vm247_vm0, %v173_v1, 0.0  ;;  %s273_s8 = sshll.u32 %s160_s7, 4  ;;  %s659_s17 = scalar_lea.hbm %s703_s1, %s381_s6  ;;  %s661_s8 = int_to_ptr.vmem [resolvable:$true] %s273_s8 }
  0x38   : > { %206 = vmatpush1.xpose.msra.mxu0 %v171_v0  ;;  %v250_v4 = vadd.f32 %v249_v3, %v248_v2  ;;  %s379_s20 = sshll.u32 %s168_s28, 2  ;;  %s256_s19 = scalar_lea.sflag [#allocation4], %s641_s25 }
  0x39   : > { %s170_s4 = scalar_lea.vmem %s704_s2, %s379_s20  ;;  %s460_s23 = scalar_lea.vmem %s661_s8, 64 }
  0x3a   : > { %251 = vadd.xlane.f32.xlu0 %v250_v4  ;;  %p461_p12 = scmp.ne.s32.totalorder %s661_s8, %s460_s23  ;;  %p715_p13 = scmp.ne.s32.totalorder %s709_s21, 0 }
  0x3b   : > { %240 = vmatmul.mubr.f32.vlgmr.msra.gmra.mxu0 %v171_v0  ;;  %s527_s13 = smov [#allocation5]  }
  0x3c   : > { %p462_p1 = pnand %p461_p12, %p715_p13  ;;  %s464_s24 = sshll.u32 %s527_s13, 4  ;;  %s465_s24 = int_to_ptr.vmem [resolvable:$false] %s464_s24 }
  0x3d   : > { %s466_s26 = scalar_lea.vmem %s465_s24, 128  ;;  %p467_p5 = scmp.lt.s32.totalorder %s661_s8, %s465_s24 }
  0x3e   : > { %p463_p3 = pneg %p462_p1  ;;  %p468_p8 = scmp.lt.s32.totalorder %s466_s26, %s460_s23 }
  0x40   : > { %p469_p10 = por %p468_p8, %p467_p5 }
  0x42   : > { %p470_p2 = pnand %p469_p10, %p463_p3 }
  0xc3   : > { %v252_v5 = vpop.xlane.xlu0 %251 }
  0xc4   : > { %254 = vst.msk [vmem:[%s170_s4] sm:$0xf] %vm253_vm1, %v252_v5 }
  0xfb   : > { %v241_v6 = vpop.f32.mrf.mxu0 }
  0xfc   : > { %246 = vst.msk [vmem:[%s160_s7] sm:$0xf] %vm245_vm2, %v241_v6 }
  0xfd   : > { %v243_v7 = vpop.f32.mrf.mxu0 }
  0xfe   : > { %473 = shalt.err (!%p470_p2)
}
  0xff   : > { %s474_s27 = scalar_lea.hbm %s659_s17, 64  ;;  %s478_s28 = scalar_lea.hbm %s703_s1, 128 }
 0x100   : > { %p475_p4 = scmp.ne.s32.totalorder %s659_s17, %s474_s27  ;;  %p479_p0 = scmp.lt.s32.totalorder %s659_s17, %s703_s1 }
 0x101   : > { %p480_p6 = scmp.lt.s32.totalorder %s478_s28, %s474_s27 }
 0x102   : > { %p476_p9 = pnand %p475_p4, %p715_p13 }
 0x103   : > { %p481_p11 = por %p480_p6, %p479_p0 }
 0x104   : > { %p477_p7 = pneg %p476_p9 }
 0x106   : > { %p482_p12 = pnand %p481_p11, %p477_p7 }
 0x108   : > { %485 = shalt.err (!%p482_p12)
}
 0x109   : > { %387 = dma.vmem_to_hbm [thread:$0]  (%p715_p13), %s661_s8, 64, %s659_s17, %s256_s19  }
 0x10a PF: > { %s288_s3 = sand.u32 1, %s512_s9   ;;  %p716_p1 = scmp.ne.s32.totalorder %s710_s22, 0 }
 0x10b   : > { %p717_p3 = scmp.ge.s32.totalorder %s524_s12, 2  ;;  %s289_s4 = scalar_lea.sflag [#allocation4], %s288_s3 }
 0x10d   : > { %p394_p5 = pnand %p717_p3, %p716_p1 }
 0x10f   : > { %p395_p8 = pneg %p394_p5 }
 0x111   : > { %507 = dma.done.wait (%p395_p8), %s289_s4, 64  }
 0x112   : > { %509 = vsyncadd (%p395_p8), %s289_s4, 4294967232  ;;  %p16_p10 = scmp.ge.s32.totalorder %s568_s15, 4   ;;  %s718_s9 = smov %s516_s10 }
 0x113   : > { %s719_s10 = smov %s520_s11  ;;  %s720_s11 = smov %s580_s18 }
 0x114   : > { %s721_s12 = smov %s568_s15  ;;  %18 = sbr.rel (!%p16_p10) target bundleno = 5 (0x5), region = 81 }
 0x119   :  { %301 = vsyncpa [#allocation3], 1 }
 0x11a   :  { %303 = vsyncpa [#allocation3 + $0x1], 1 }
 0x11b   :  { %304 = vsyncpa [#allocation4], 1 }
 0x11c   :  { %306 = vsyncpa [#allocation4 + $0x1], 1 }

</bundles_post_ra>
